<compile_context>
chip_gen: v5e
topology: v5e:2x2
jax: 0.10.0
libtpu: 0.0.40
codegen_flags: <defaults>
</compile_context>

<pallas_src>
import math

import jax
import jax.numpy as jnp
from jax.experimental import pallas as pl
from jax.experimental.pallas import tpu as pltpu


def mlp_kernel(x_ref, w1_ref, b1_ref, w2_ref, b2_ref, w3_ref, b3_ref, o_ref):
    # Layer 1: bf16 MXU matmul with f32 accumulation; bias + ReLU in f32 (VPU).
    h1 = jnp.dot(x_ref[...], w1_ref[...], preferred_element_type=jnp.float32)
    h1 = jnp.maximum(h1 + b1_ref[...], 0.0)
    # Layer 2: cast activations back to bf16 for the MXU, accumulate in f32.
    h2 = jnp.dot(h1.astype(jnp.bfloat16), w2_ref[...],
                 preferred_element_type=jnp.float32)
    h2 = jnp.maximum(h2 + b2_ref[...], 0.0)
    # Layer 3: Linear, no activation.
    out = jnp.dot(h2.astype(jnp.bfloat16), w3_ref[...],
                  preferred_element_type=jnp.float32)
    o_ref[...] = (out + b3_ref[...]).astype(o_ref.dtype)


def _round_up(x, m):
    return (x + m - 1) // m * m


def _lane_pad(d, lane=128):
    return _round_up(max(int(d), 1), lane)


def _vmem_budget_bytes(block_b, obs_dim, h_dim, act_dim):
    """VMEM estimate: 2x(x tile) + 2x(out tile) + 2x(weights+biases) + f32 intermediates."""
    x_tile = block_b * _lane_pad(obs_dim) * 2            # bf16 input tile
    out_tile = block_b * _lane_pad(act_dim) * 4          # f32 output tile
    w_bytes = (_lane_pad(obs_dim) * _lane_pad(h_dim)
               + _lane_pad(h_dim) * _lane_pad(h_dim)
               + _lane_pad(h_dim) * _lane_pad(act_dim)) * 2   # bf16 weights
    b_bytes = (8 * _lane_pad(h_dim) * 2 + 8 * _lane_pad(act_dim)) * 4  # f32, sublane-padded
    inter = 2 * block_b * _lane_pad(h_dim) * 4           # h1, h2 in f32
    total = 2 * x_tile + 2 * out_tile + 2 * (w_bytes + b_bytes) + inter
    return int(total) + (8 << 20)                        # headroom for internal matmul tiling


def clone_policy_forward(x, params, *, block_b=512):
    """ClonePolicy MLP forward with one Pallas kernel.

    x:      (B, obs_dim) float32 (cast to bf16 for the MXU inside the wrapper)
    params: dict with w1 (obs_dim,h), b1 (1,h), w2 (h,h), b2 (1,h),
            w3 (h,act_dim), b3 (1,act_dim)
    """
    w1, b1 = params["w1"], params["b1"]
    w2, b2 = params["w2"], params["b2"]
    w3, b3 = params["w3"], params["b3"]

    B, obs_dim = x.shape
    h_dim = w1.shape[1]
    act_dim = w3.shape[1]

    # Fixed batch tile: multiple of 8 sublanes, clamped for small batches so we
    # do not over-pad; at large B this keeps grid >> 1 (pipelining + megacore).
    block_b = max(8, _round_up(min(block_b, _round_up(B, 8)), 8))
    B_pad = _round_up(B, block_b)
    grid = (B_pad // block_b,)

    # bf16 MXU inputs: halves HBM bytes on the x stream; biases stay f32.
    x_bf = x.astype(jnp.bfloat16)
    if B_pad != B:
        x_bf = jnp.pad(x_bf, ((0, B_pad - B), (0, 0)))
    w1b = w1.astype(jnp.bfloat16)
    w2b = w2.astype(jnp.bfloat16)
    w3b = w3.astype(jnp.bfloat16)
    b1f = b1.astype(jnp.float32)
    b2f = b2.astype(jnp.float32)
    b3f = b3.astype(jnp.float32)

    # Weights / biases: full-array blocks with a constant index map so the
    # pipeline keeps them resident in VMEM across the whole grid.
    const_spec = lambda shape: pl.BlockSpec(shape, lambda i: (0, 0))

    out = pl.pallas_call(
        mlp_kernel,
        out_shape=jax.ShapeDtypeStruct((B_pad, act_dim), jnp.float32),
        grid_spec=pl.GridSpec(
            grid=grid,
            in_specs=[
                pl.BlockSpec((block_b, obs_dim), lambda i: (i, 0)),  # x: streamed tile
                const_spec((obs_dim, h_dim)),                        # w1
                const_spec((1, h_dim)),                              # b1
                const_spec((h_dim, h_dim)),                          # w2
                const_spec((1, h_dim)),                              # b2
                const_spec((h_dim, act_dim)),                        # w3
                const_spec((1, act_dim)),                            # b3
            ],
            # act_dim < 128 lanes -> masked stores; amortized by large block_b
            # (output bytes are tiny relative to the x input stream).
            out_specs=pl.BlockSpec((block_b, act_dim), lambda i: (i, 0)),
        ),
        compiler_params=pltpu.CompilerParams(
            dimension_semantics=("parallel",),
            vmem_limit_bytes=_vmem_budget_bytes(block_b, obs_dim, h_dim, act_dim),
        ),
    )(x_bf, w1b, b1f, w2b, b2f, w3b, b3f)

    return out[:B] if B_pad != B else out


def init_params(key, obs_dim, h_dim, act_dim, dtype=jnp.float32):
    """Deterministic init mimicking torch.nn.Linear default (U[-1/sqrt(in), 1/sqrt(in)])."""
    keys = jax.random.split(key, 6)

    def linear(kw, kb, in_dim, out_dim):
        bound = 1.0 / math.sqrt(in_dim)
        w = jax.random.uniform(kw, (in_dim, out_dim), dtype, -bound, bound)
        b = jax.random.uniform(kb, (1, out_dim), dtype, -bound, bound)
        return w, b

    w1, b1 = linear(keys[0], keys[1], obs_dim, h_dim)
    w2, b2 = linear(keys[2], keys[3], h_dim, h_dim)
    w3, b3 = linear(keys[4], keys[5], h_dim, act_dim)
    return {"w1": w1, "b1": b1, "w2": w2, "b2": b2, "w3": w3, "b3": b3}


def reference_forward(x, p):
    """Pure-JAX reference mirroring the kernel numerics (bf16 MXU inputs, f32 accum)."""
    bf, f32 = jnp.bfloat16, jnp.float32
    h1 = jnp.maximum(
        jnp.dot(x.astype(bf), p["w1"].astype(bf), preferred_element_type=f32) + p["b1"], 0.0)
    h2 = jnp.maximum(
        jnp.dot(h1.astype(bf), p["w2"].astype(bf), preferred_element_type=f32) + p["b2"], 0.0)
    return jnp.dot(h2.astype(bf), p["w3"].astype(bf), preferred_element_type=f32) + p["b3"]


if __name__ == "__main__":
    obs_dim, h_dim, act_dim = 16, 32, 8
    batch = 250  # deliberately NOT a multiple of block_b to exercise the padding path

    key = jax.random.PRNGKey(0)
    k_x, k_p = jax.random.split(key)
    x = jax.random.normal(k_x, (batch, obs_dim), jnp.float32)
    params = init_params(k_p, obs_dim, h_dim, act_dim)

    # block_b=64 -> padded batch 256, grid=(4,): pipelined + megacore-shardable.
    out = clone_policy_forward(x, params, block_b=64)
    out = jax.block_until_ready(out)

    ref = reference_forward(x, params)
    assert out.shape == (batch, act_dim)
    assert jnp.allclose(out, ref, atol=2e-3, rtol=2e-3), "mismatch vs JAX reference"

    print("KERNEL_OK")
</pallas_src>

<mosaic_0001>
module attributes {stable_mosaic.version = 11 : i64} {
  func.func @mlp_kernel(%arg0: i32, %arg1: memref<64x16xbf16, #tpu.memory_space<vmem>>, %arg2: memref<16x32xbf16, #tpu.memory_space<vmem>>, %arg3: memref<1x32xf32, #tpu.memory_space<vmem>>, %arg4: memref<32x32xbf16, #tpu.memory_space<vmem>>, %arg5: memref<1x32xf32, #tpu.memory_space<vmem>>, %arg6: memref<32x8xbf16, #tpu.memory_space<vmem>>, %arg7: memref<1x8xf32, #tpu.memory_space<vmem>>, %arg8: memref<64x8xf32, #tpu.memory_space<vmem>>) attributes {dimension_semantics = [#tpu.dimension_semantics<parallel>], iteration_bounds = array<i64: 4>, scalar_prefetch = 0 : i64, scratch_operands = 0 : i64, tpu.core_type = #tpu.core_type<tc>, window_params = [{transform_indices = @transform_0, window_bounds = array<i64: 64, 16>}, {pipeline_mode = #tpu.pipeline_mode<synchronous>, transform_indices = @transform_1, window_bounds = array<i64: 16, 32>}, {pipeline_mode = #tpu.pipeline_mode<synchronous>, transform_indices = @transform_2, window_bounds = array<i64: 1, 32>}, {pipeline_mode = #tpu.pipeline_mode<synchronous>, transform_indices = @transform_3, window_bounds = array<i64: 32, 32>}, {pipeline_mode = #tpu.pipeline_mode<synchronous>, transform_indices = @transform_4, window_bounds = array<i64: 1, 32>}, {pipeline_mode = #tpu.pipeline_mode<synchronous>, transform_indices = @transform_5, window_bounds = array<i64: 32, 8>}, {pipeline_mode = #tpu.pipeline_mode<synchronous>, transform_indices = @transform_6, window_bounds = array<i64: 1, 8>}, {transform_indices = @transform_7, window_bounds = array<i64: 64, 8>}]} {
    %c0 = arith.constant 0 : index
    %c0_0 = arith.constant 0 : index
    %0 = vector.load %arg1[%c0, %c0_0] : memref<64x16xbf16, #tpu.memory_space<vmem>>, vector<64x16xbf16>
    %c0_1 = arith.constant 0 : index
    %c0_2 = arith.constant 0 : index
    %1 = vector.load %arg2[%c0_1, %c0_2] : memref<16x32xbf16, #tpu.memory_space<vmem>>, vector<16x32xbf16>
    %cst = arith.constant dense<0.000000e+00> : vector<64x32xf32>
    %2 = tpu.matmul %0, %1, %cst {dimension_numbers = #tpu.dot_dimension_numbers<[1], [0], [0], [1], [0, 0, 1, 1], [], []>} : vector<64x16xbf16>, vector<16x32xbf16>, vector<64x32xf32> -> vector<64x32xf32>
    %c0_3 = arith.constant 0 : index
    %c0_4 = arith.constant 0 : index
    %3 = vector.load %arg3[%c0_3, %c0_4] : memref<1x32xf32, #tpu.memory_space<vmem>>, vector<1x32xf32>
    %4 = vector.broadcast %3 : vector<1x32xf32> to vector<64x32xf32>
    %5 = arith.addf %2, %4 : vector<64x32xf32>
    %cst_5 = arith.constant 0.000000e+00 : f32
    %6 = vector.broadcast %cst_5 : f32 to vector<64x32xf32>
    %7 = arith.maximumf %5, %6 : vector<64x32xf32>
    %8 = arith.truncf %7 : vector<64x32xf32> to vector<64x32xbf16>
    %c0_6 = arith.constant 0 : index
    %c0_7 = arith.constant 0 : index
    %9 = vector.load %arg4[%c0_6, %c0_7] : memref<32x32xbf16, #tpu.memory_space<vmem>>, vector<32x32xbf16>
    %cst_8 = arith.constant dense<0.000000e+00> : vector<64x32xf32>
    %10 = tpu.matmul %8, %9, %cst_8 {dimension_numbers = #tpu.dot_dimension_numbers<[1], [0], [0], [1], [0, 0, 1, 1], [], []>} : vector<64x32xbf16>, vector<32x32xbf16>, vector<64x32xf32> -> vector<64x32xf32>
    %c0_9 = arith.constant 0 : index
    %c0_10 = arith.constant 0 : index
    %11 = vector.load %arg5[%c0_9, %c0_10] : memref<1x32xf32, #tpu.memory_space<vmem>>, vector<1x32xf32>
    %12 = vector.broadcast %11 : vector<1x32xf32> to vector<64x32xf32>
    %13 = arith.addf %10, %12 : vector<64x32xf32>
    %cst_11 = arith.constant 0.000000e+00 : f32
    %14 = vector.broadcast %cst_11 : f32 to vector<64x32xf32>
    %15 = arith.maximumf %13, %14 : vector<64x32xf32>
    %16 = arith.truncf %15 : vector<64x32xf32> to vector<64x32xbf16>
    %c0_12 = arith.constant 0 : index
    %c0_13 = arith.constant 0 : index
    %17 = vector.load %arg6[%c0_12, %c0_13] : memref<32x8xbf16, #tpu.memory_space<vmem>>, vector<32x8xbf16>
    %cst_14 = arith.constant dense<0.000000e+00> : vector<64x8xf32>
    %18 = tpu.matmul %16, %17, %cst_14 {dimension_numbers = #tpu.dot_dimension_numbers<[1], [0], [0], [1], [0, 0, 1, 1], [], []>} : vector<64x32xbf16>, vector<32x8xbf16>, vector<64x8xf32> -> vector<64x8xf32>
    %c0_15 = arith.constant 0 : index
    %c0_16 = arith.constant 0 : index
    %19 = vector.load %arg7[%c0_15, %c0_16] : memref<1x8xf32, #tpu.memory_space<vmem>>, vector<1x8xf32>
    %20 = vector.broadcast %19 : vector<1x8xf32> to vector<64x8xf32>
    %21 = arith.addf %18, %20 : vector<64x8xf32>
    %c0_17 = arith.constant 0 : index
    %c0_18 = arith.constant 0 : index
    %22 = vector.load %arg8[%c0_17, %c0_18] : memref<64x8xf32, #tpu.memory_space<vmem>>, vector<64x8xf32>
    tpu.vector_store %arg8[%c0_17, %c0_18], %21 {strides = array<i32>} : memref<64x8xf32, #tpu.memory_space<vmem>>, vector<64x8xf32>,
    return
  }
  func.func @transform_0(%arg0: i32) -> (i32, i32) {
    %c0_i32 = arith.constant 0 : i32
    %c0_i32_0 = arith.constant 0 : i32
    return %arg0, %c0_i32 : i32, i32
  }
  func.func @transform_1(%arg0: i32) -> (i32, i32) {
    %c0_i32 = arith.constant 0 : i32
    %c0_i32_0 = arith.constant 0 : i32
    %c0_i32_1 = arith.constant 0 : i32
    return %c0_i32, %c0_i32_0 : i32, i32
  }
  func.func @transform_2(%arg0: i32) -> (i32, i32) {
    %c0_i32 = arith.constant 0 : i32
    %c0_i32_0 = arith.constant 0 : i32
    %c0_i32_1 = arith.constant 0 : i32
    return %c0_i32, %c0_i32_0 : i32, i32
  }
  func.func @transform_3(%arg0: i32) -> (i32, i32) {
    %c0_i32 = arith.constant 0 : i32
    %c0_i32_0 = arith.constant 0 : i32
    %c0_i32_1 = arith.constant 0 : i32
    return %c0_i32, %c0_i32_0 : i32, i32
  }
  func.func @transform_4(%arg0: i32) -> (i32, i32) {
    %c0_i32 = arith.constant 0 : i32
    %c0_i32_0 = arith.constant 0 : i32
    %c0_i32_1 = arith.constant 0 : i32
    return %c0_i32, %c0_i32_0 : i32, i32
  }
  func.func @transform_5(%arg0: i32) -> (i32, i32) {
    %c0_i32 = arith.constant 0 : i32
    %c0_i32_0 = arith.constant 0 : i32
    %c0_i32_1 = arith.constant 0 : i32
    return %c0_i32, %c0_i32_0 : i32, i32
  }
  func.func @transform_6(%arg0: i32) -> (i32, i32) {
    %c0_i32 = arith.constant 0 : i32
    %c0_i32_0 = arith.constant 0 : i32
    %c0_i32_1 = arith.constant 0 : i32
    return %c0_i32, %c0_i32_0 : i32, i32
  }
  func.func @transform_7(%arg0: i32) -> (i32, i32) {
    %c0_i32 = arith.constant 0 : i32
    %c0_i32_0 = arith.constant 0 : i32
    return %arg0, %c0_i32 : i32, i32
  }
}

</mosaic_0001>

<bundles_post_ra>
// kernel: tpu_custom_call.1
= control target key start
LH: loop header
LB: loop body
LE: loop exit
PB: predicated region body
PF: predicated region fallthrough
CT: control target
= control target key end

     0   :  { %s708_s24 = smov 0   ;;  %s769_s0 = inlined_call_operand.vmem [shape: bf16[256,16], index: 0, kind: input, shape index: {}]   ;;  %s770_s1 = inlined_call_operand.vmem [shape: bf16[16,32], index: 1, kind: input, shape index: {}]   ;;  %s771_s2 = inlined_call_operand.vmem [shape: f32[1,32], index: 2, kind: input, shape index: {}]   ;;  %s772_s3 = inlined_call_operand.vmem [shape: bf16[32,32], index: 3, kind: input, shape index: {}]   ;;  %s773_s4 = inlined_call_operand.vmem [shape: f32[1,32], index: 4, kind: input, shape index: {}]   ;;  %s774_s5 = inlined_call_operand.vmem [shape: bf16[32,8], index: 5, kind: input, shape index: {}]   ;;  %s775_s6 = inlined_call_operand.vmem [shape: f32[1,8], index: 6, kind: input, shape index: {}]   ;;  %s776_s7 = inlined_call_operand.vmem [shape: f32[256,8], index: 7, kind: output, shape index: {}]  }
   0x1 LB: > { %s577_s25 = sadd.s32 4294967295, %s666_s24   ;;  %p581_p0 = scmp.ge.s32.totalorder %s666_s24, 1  ;;  %s666_s24 = sphi %s708_s24, %s17_s24  }
   0x2   : > { %p238_p1 = scmp.lt.s32.totalorder %s666_s24, 5 }
   0x4   : > { %p239_p2 = pnand %p581_p0, %p238_p1 }
   0x5   : > { %s582_s28 = sshll.u32 (!%p239_p2), %s577_s25, 3 }
   0x6   : > { %242 = sbr.rel (%p239_p2) target bundleno = 492 (0x1ec), region = 48  ;;  %p271_p3 = scmp.lt.s32.totalorder (!%p239_p2), %s582_s28, 31 }
   0xb   : > { %v640_v0 = vld [vmem:[%s770_s1] sm:$0xff]  ;;  %s778_s28 = smov (!%p271_p3, %s582_s28), 31  ;;  %vm323_vm0 = vcmask 130048   ;;  %v642_v5 = vld [vmem:[%s772_s3 + $0x8] sm:$0xff]  ;;  %vm397_vm1 = vcmask 261120   ;;  %vm512_vm2 = vcmask 64512  }
   0xc   : > { %343 = vmatpush.bf16.msra.mxu0 %v640_v0  ;;  %s583_s29 = sshll.u32 %s778_s28, 2  ;;  %416 = vmatpush.bf16.msra.mxu1 %v642_v5  ;;  %v641_v6 = vld [vmem:[%s772_s3] sm:$0xff]  ;;  %v644_v36 = vld [vmem:[%s774_s5 + $0x8] sm:$0xff]  ;;  %s585_s22 = sshll.u32 %s778_s28, 3 }
   0xd   : > { %s274_s9 = scalar_lea.vmem %s769_s0, %s583_s29  ;;  %645 = vmatpush.bf16.msra.mxu3 %v642_v5  ;;  %v657_v8 = vld [vmem:[%s771_s2] ss:$0 sm:$0xff]  ;;  %647 = vmatpush.bf16.msra.mxu2 %v644_v36  ;;  %s280_s29 = scalar_lea.vmem %s776_s7, %s585_s22 }
   0xe   : > { %v636_v1 = vld [vmem:[%s274_s9] sm:$0xff]  ;;  %v637_v2 = vld [vmem:[%s274_s9 + $0x8] sm:$0xff]  ;;  %v638_v3 = vld [vmem:[%s274_s9 + $0x10] sm:$0xff] }
   0xf   : > { %606 = vmatmul.msk.bf16.vlgmr.msra.gmra.mxu0 %vm323_vm0, %v636_v1  ;;  %v639_v4 = vld [vmem:[%s274_s9 + $0x18] sm:$0xff]  ;;  %v643_v37 = vld [vmem:[%s774_s5] sm:$0xff] }
  0x10   : > { %417 = vmatpush.bf16.msra.mxu1 %v641_v6  ;;  %v658_v39 = vld [vmem:[%s773_s4] ss:$0 sm:$0xff] }
  0x11   : > { %646 = vmatpush.bf16.msra.mxu3 %v641_v6  ;;  %648 = vmatpush.bf16.msra.mxu2 %v643_v37 }
  0x14   : > { %489 = vmatpush.bf16.msrb.mxu1 %v644_v36 }
  0x18   : > { %490 = vmatpush.bf16.msrb.mxu1 %v643_v37 }
  0x1f   : > { %607 = vmatmul.msk.bf16.gmra.mxu0 %vm323_vm0, %v637_v2 }
  0x2f   : > { %608 = vmatmul.msk.bf16.gmra.mxu0 %vm323_vm0, %v638_v3  ;;  %v659_v3 = vld [vmem:[%s775_s6] ss:$0 sm:$0xff] }
  0x3f   : > { %609 = vmatmul.msk.bf16.gmra.mxu0 %vm323_vm0, %v639_v4 }
  0x8c   : > { %v345_v7 = vpop.f32.mrf.mxu0 }
  0x8d   : > { %v346_v9 = vadd.f32 %v657_v8, %v345_v7 }
  0x8f   : > { %v365_v12 = vmax.f32 %v346_v9, 0.0 }
  0x94   : > { %v347_v10 = vpop.f32.mrf.mxu0 }
  0x95   : > { %v348_v11 = vadd.f32 %v657_v8, %v347_v10 }
  0x97   : > { %v366_v13 = vmax.f32 %v348_v11, 0.0 }
  0x99   : > { %v373_v14 = vpack.c.bf16 %v366_v13, %v365_v12 }
  0x9b   : > { %618 = vmatmul.msk.bf16.vlgmr.msra.gmra.mxu1 %vm397_vm1, %v373_v14 }
  0x9c   : > { %v350_v15 = vpop.f32.mrf.mxu0 }
  0x9d   : > { %v351_v16 = vadd.f32 %v657_v8, %v350_v15 }
  0x9f   : > { %v367_v19 = vmax.f32 %v351_v16, 0.0 }
  0xa4   : > { %v352_v17 = vpop.f32.mrf.mxu0 }
  0xa5   : > { %v353_v18 = vadd.f32 %v657_v8, %v352_v17 }
  0xa7   : > { %v368_v20 = vmax.f32 %v353_v18, 0.0 }
  0xa9   : > { %v374_v21 = vpack.c.bf16 %v368_v20, %v367_v19 }
  0xab   : > { %619 = vmatmul.msk.bf16.vlgmr.msra.gmra.mxu3 %vm397_vm1, %v374_v21 }
  0xac   : > { %v355_v22 = vpop.f32.mrf.mxu0 }
  0xad   : > { %v356_v23 = vadd.f32 %v657_v8, %v355_v22 }
  0xaf   : > { %v369_v26 = vmax.f32 %v356_v23, 0.0 }
  0xb4   : > { %v357_v24 = vpop.f32.mrf.mxu0 }
  0xb5   : > { %v358_v25 = vadd.f32 %v657_v8, %v357_v24 }
  0xb7   : > { %v370_v27 = vmax.f32 %v358_v25, 0.0 }
  0xb9   : > { %v375_v28 = vpack.c.bf16 %v370_v27, %v369_v26 }
  0xbb   : > { %620 = vmatmul.msk.bf16.gmra.mxu3 %vm397_vm1, %v375_v28 }
  0xbc   : > { %v360_v29 = vpop.f32.mrf.mxu0 }
  0xbd   : > { %v361_v30 = vadd.f32 %v657_v8, %v360_v29 }
  0xbf   : > { %v371_v33 = vmax.f32 %v361_v30, 0.0 }
  0xc4   : > { %v362_v31 = vpop.f32.mrf.mxu0 }
  0xc5   : > { %v363_v32 = vadd.f32 %v657_v8, %v362_v31 }
  0xc7   : > { %v372_v34 = vmax.f32 %v363_v32, 0.0 }
  0xc9   : > { %v376_v35 = vpack.c.bf16 %v372_v34, %v371_v33 }
  0xcb   : > { %621 = vmatmul.msk.bf16.gmra.mxu3 %vm397_vm1, %v376_v35 }
 0x118   : > { %v419_v38 = vpop.f32.mrf.mxu1 }
 0x119   : > { %v420_v40 = vadd.f32 %v658_v39, %v419_v38 }
 0x11b   : > { %v439_v43 = vmax.f32 %v420_v40, 0.0 }
 0x120   : > { %v421_v41 = vpop.f32.mrf.mxu1 }
 0x121   : > { %v422_v42 = vadd.f32 %v658_v39, %v421_v41 }
 0x123   : > { %v440_v44 = vmax.f32 %v422_v42, 0.0 }
 0x125   : > { %v447_v45 = vpack.c.bf16 %v440_v44, %v439_v43 }
 0x127   : > { %630 = vmatmul.msk.bf16.vlgmr.msrb.gmra.mxu1 %vm397_vm1, %v447_v45 }
 0x12e   : > { %v424_v46 = vpop.f32.mrf.mxu3 }
 0x12f   : > { %v425_v47 = vadd.f32 %v658_v39, %v424_v46 }
 0x131   : > { %v441_v50 = vmax.f32 %v425_v47, 0.0 }
 0x136   : > { %v426_v48 = vpop.f32.mrf.mxu3 }
 0x137   : > { %v427_v49 = vadd.f32 %v658_v39, %v426_v48 }
 0x139   : > { %v442_v51 = vmax.f32 %v427_v49, 0.0 }
 0x13b   : > { %v448_v52 = vpack.c.bf16 %v442_v51, %v441_v50 }
 0x13d   : > { %631 = vmatmul.msk.bf16.vlgmr.msra.gmra.mxu2 %vm397_vm1, %v448_v52 }
 0x13e   : > { %v429_v53 = vpop.f32.mrf.mxu3 }
 0x13f   : > { %v430_v54 = vadd.f32 %v658_v39, %v429_v53 }
 0x141   : > { %v443_v57 = vmax.f32 %v430_v54, 0.0 }
 0x146   : > { %v431_v55 = vpop.f32.mrf.mxu3 }
 0x147   : > { %v432_v56 = vadd.f32 %v658_v39, %v431_v55 }
 0x149   : > { %v444_v58 = vmax.f32 %v432_v56, 0.0 }
 0x14b   : > { %v449_v59 = vpack.c.bf16 %v444_v58, %v443_v57 }
 0x14d   : > { %632 = vmatmul.msk.bf16.gmra.mxu2 %vm397_vm1, %v449_v59 }
 0x14e   : > { %v434_v60 = vpop.f32.mrf.mxu3 }
 0x14f   : > { %v435_v61 = vadd.f32 %v658_v39, %v434_v60 }
 0x151   : > { %v445_v0 = vmax.f32 %v435_v61, 0.0 }
 0x156   : > { %v436_v62 = vpop.f32.mrf.mxu3 }
 0x157   : > { %v437_v63 = vadd.f32 %v658_v39, %v436_v62 }
 0x159   : > { %v446_v1 = vmax.f32 %v437_v63, 0.0 }
 0x15b   : > { %v450_v2 = vpack.c.bf16 %v446_v1, %v445_v0 }
 0x15d   : > { %633 = vmatmul.msk.bf16.gmra.mxu2 %vm397_vm1, %v450_v2 }
 0x1a4   : > { %v492_v4 = vpop.f32.mrf.mxu1 }
 0x1a5   : > { %v493_v5 = vadd.f32 %v659_v3, %v492_v4 }
 0x1a7   : > { %513 = vst.msk [vmem:[%s280_s29] sm:$0xff] %vm512_vm2, %v493_v5 }
 0x1ac   : > { %v494_v6 = vpop.f32.mrf.mxu1 }
 0x1ad   : > { %v495_v7 = vadd.f32 %v659_v3, %v494_v6 }
 0x1af   : > { %514 = vst.msk [vmem:[%s280_s29 + $0x8] sm:$0xff] %vm512_vm2, %v495_v7 }
 0x1c0   : > { %v497_v8 = vpop.f32.mrf.mxu2 }
 0x1c1   : > { %v498_v9 = vadd.f32 %v659_v3, %v497_v8 }
 0x1c3   : > { %515 = vst.msk [vmem:[%s280_s29 + $0x10] sm:$0xff] %vm512_vm2, %v498_v9 }
 0x1c8   : > { %v499_v10 = vpop.f32.mrf.mxu2 }
 0x1c9   : > { %v500_v11 = vadd.f32 %v659_v3, %v499_v10 }
 0x1cb   : > { %516 = vst.msk [vmem:[%s280_s29 + $0x18] sm:$0xff] %vm512_vm2, %v500_v11 }
 0x1d0   : > { %v502_v12 = vpop.f32.mrf.mxu2 }
 0x1d1   : > { %v503_v13 = vadd.f32 %v659_v3, %v502_v12 }
 0x1d3   : > { %517 = vst.msk [vmem:[%s280_s29 + $0x20] sm:$0xff] %vm512_vm2, %v503_v13 }
 0x1d8   : > { %v504_v14 = vpop.f32.mrf.mxu2 }
 0x1d9   : > { %v505_v15 = vadd.f32 %v659_v3, %v504_v14 }
 0x1db   : > { %518 = vst.msk [vmem:[%s280_s29 + $0x28] sm:$0xff] %vm512_vm2, %v505_v15 }
 0x1e0   : > { %v507_v16 = vpop.f32.mrf.mxu2 }
 0x1e1   : > { %v508_v17 = vadd.f32 %v659_v3, %v507_v16 }
 0x1e3   : > { %519 = vst.msk [vmem:[%s280_s29 + $0x30] sm:$0xff] %vm512_vm2, %v508_v17 }
 0x1e8   : > { %v509_v18 = vpop.f32.mrf.mxu2 }
 0x1e9   : > { %v510_v19 = vadd.f32 %v659_v3, %v509_v18 }
 0x1eb   : > { %520 = vst.msk [vmem:[%s280_s29 + $0x38] sm:$0xff] %vm512_vm2, %v510_v19 }
 0x1ec PF: > { %s17_s24 = sadd.s32 1, %s666_s24  }
 0x1ed   : > { %p14_p4 = scmp.ge.s32.totalorder %s17_s24, 6  }
 0x1ef   :  { %16 = sbr.rel (!%p14_p4) target bundleno = 1 (0x1), region = 78 }

</bundles_post_ra>
